<compile_context>
chip_gen: v7x
topology: tpu7x:2x2x1
jax: 0.10.0
libtpu: 0.0.40
codegen_flags: <defaults>
</compile_context>

<pallas_src>
import jax
import jax.numpy as jnp
from jax.experimental import pallas as pl
from jax.experimental.pallas import tpu as pltpu


def _round_up(x, m):
    return ((x + m - 1) // m) * m


def _cdiv(a, b):
    return (a + b - 1) // b


def _vmem_limit_bytes():
    """Scoped-VMEM limit to request, derived from the actual chip."""
    cap = 64 * 1024 * 1024  # conservative default: v7x per-TensorCore VMEM
    try:
        info = pltpu.get_tpu_info()
        cap_attr = getattr(info, "vmem_capacity_bytes", None)
        if cap_attr:
            cap = int(cap_attr)
    except Exception:
        pass
    # Keep 25% headroom for compiler-internal scratch; 96 MiB absolute cap.
    return int(min(cap * 3 // 4, 96 * 1024 * 1024))


def _make_kernel(n_feat, d_offsets, d_dims, total_d, d_pad):
    def kernel(*refs):
        x_refs = refs[:n_feat]
        w_ref, b_ref, out_ref, x_scratch = refs[n_feat:]

        # Assemble the concatenated (tb, d_pad) input tile in VMEM once per
        # batch tile (the channel-group axis j is the inner grid axis).
        @pl.when(pl.program_id(1) == 0)
        def _assemble():
            if d_pad > total_d:  # static python branch
                x_scratch[:, total_d:] = jnp.zeros(
                    (x_scratch.shape[0], d_pad - total_d), x_scratch.dtype)
            for off, dk, x_ref in zip(d_offsets, d_dims, x_refs):
                x_scratch[:, off:off + dk] = x_ref[...]

        acc = jnp.dot(x_scratch[...], w_ref[...],
                      preferred_element_type=jnp.float32)
        acc = acc + b_ref[...]                      # (1, tc) f32 bias broadcast
        out_ref[...] = acc.astype(out_ref.dtype)    # single lane-dense store

    return kernel


def pack_multi_feature_params(params, dtype):
    """Build the block-diagonal weight / bias ONCE (outside the per-call path).

    params: {key: {"w": (D_k, C_k), "b": (C_k,)}} ; channel order = sorted keys.
    """
    keys = sorted(params.keys())
    dtype = jnp.dtype(dtype)
    itemsize = dtype.itemsize
    d_dims = [int(params[k]["w"].shape[0]) for k in keys]
    c_dims = [int(params[k]["w"].shape[1]) for k in keys]
    total_d, total_c = sum(d_dims), sum(c_dims)
    d_pad = _round_up(total_d, 128)
    c_pad = _round_up(total_c, 128)

    vmem_limit = _vmem_limit_bytes()

    # Decide weight residency: keep the whole block-diagonal slab resident
    # (single-buffered) if it fits in ~1/3 of the VMEM budget; otherwise stream
    # it in channel groups of width tc (double-buffered).
    weight_budget = max(vmem_limit // 3, 1 << 20)
    if d_pad * c_pad * itemsize <= weight_budget:
        tc, n_ctiles = c_pad, 1
    else:
        tc = max(128, ((weight_budget // (2 * d_pad * itemsize)) // 128) * 128)
        n_ctiles = _cdiv(c_pad, tc)
        c_pad = n_ctiles * tc  # make tc divide c_pad exactly

    w_cat = jnp.zeros((d_pad, c_pad), dtype)
    b_cat = jnp.zeros((1, c_pad), jnp.float32)
    d_offsets, c_offsets = [], []
    d_off = c_off = 0
    for k, dk, ck in zip(keys, d_dims, c_dims):
        d_offsets.append(d_off)
        c_offsets.append(c_off)
        w_cat = w_cat.at[d_off:d_off + dk, c_off:c_off + ck].set(
            params[k]["w"].astype(dtype))
        b_cat = b_cat.at[0, c_off:c_off + ck].set(
            params[k]["b"].astype(jnp.float32))
        d_off += dk
        c_off += ck

    return dict(keys=keys, d_dims=d_dims, c_dims=c_dims, d_offsets=d_offsets,
                total_d=total_d, total_c=total_c, d_pad=d_pad, c_pad=c_pad,
                tc=tc, n_ctiles=n_ctiles, dtype=dtype, itemsize=itemsize,
                vmem_limit=vmem_limit, w_cat=w_cat, b_cat=b_cat)


def multi_feature_embedding(inputs, packed):
    """inputs: {key: (B, D_k)} ; packed: result of pack_multi_feature_params.

    Returns (B, sum_k C_k) with channel slices in sorted-key order, matching
    MultiFeatureEmbedding.forward.
    """
    keys = packed["keys"]
    d_dims = packed["d_dims"]
    dtype = packed["dtype"]
    itemsize = packed["itemsize"]
    total_d, total_c = packed["total_d"], packed["total_c"]
    d_pad, c_pad = packed["d_pad"], packed["c_pad"]
    tc, n_ctiles = packed["tc"], packed["n_ctiles"]
    vmem_limit = packed["vmem_limit"]

    batch = int(inputs[keys[0]].shape[0])
    for k, dk in zip(keys, d_dims):
        assert inputs[k].shape == (batch, dk), f"shape mismatch for {k!r}"
        assert inputs[k].dtype == dtype, f"dtype mismatch for {k!r}"

    # ---- batch tile sizing (VMEM-budgeted, generation-safe) ----
    sublane = max(8, 32 // itemsize)              # 8 f32 / 16 bf16 / 32 int8
    w_bufs = 1 if n_ctiles == 1 else 2            # Buffered(1) when resident
    fixed = w_bufs * d_pad * tc * itemsize + w_bufs * tc * 4   # weights + bias
    headroom = 2 * 1024 * 1024
    d_eff = sum(_round_up(dk, 128) for dk in d_dims)  # lane-padded input bufs
    per_row = (itemsize * (2 * d_eff + d_pad + 2 * tc)   # inputs + scratch + out
               + 4 * tc)                                  # f32 accumulator
    avail = max(vmem_limit - fixed - headroom, per_row * sublane)
    tb_cap = max(sublane, min(2048, (avail // per_row) // sublane * sublane))

    # Balanced tiles (minimize padding); >= up-to-4 tiles so the "parallel"
    # batch axis can shard across v7x's two TensorCores when batch allows.
    min_tiles = min(4, max(1, batch // sublane))
    n_btiles = max(_cdiv(batch, tb_cap), min_tiles)
    tb = min(tb_cap, _round_up(_cdiv(batch, n_btiles), sublane))
    n_btiles = _cdiv(batch, tb)
    b_pad = n_btiles * tb

    xs = [inputs[k] for k in keys]
    if b_pad > batch:
        xs = [jnp.pad(x, ((0, b_pad - batch), (0, 0))) for x in xs]

    kernel = _make_kernel(len(keys), packed["d_offsets"], d_dims, total_d, d_pad)

    # Advisory cost estimate with the padded shapes actually moved / computed.
    flops = 2 * b_pad * d_pad * c_pad
    w_hbm_reads = (1 if n_ctiles == 1 else n_btiles) * d_pad * c_pad * itemsize
    bytes_accessed = int(b_pad * total_d * itemsize + w_hbm_reads
                         + c_pad * 4 + b_pad * c_pad * itemsize)
    cost = pl.CostEstimate(flops=int(flops), transcendentals=0,
                           bytes_accessed=bytes_accessed)

    def _build(single_buffer_weights):
        extra = {"pipeline_mode": pl.Buffered(1)} if single_buffer_weights else {}
        in_specs = [pl.BlockSpec((tb, dk), lambda i, j: (i, 0)) for dk in d_dims]
        in_specs.append(pl.BlockSpec((d_pad, tc), lambda i, j: (0, j), **extra))
        in_specs.append(pl.BlockSpec((1, tc), lambda i, j: (0, j), **extra))
        return pl.pallas_call(
            kernel,
            out_shape=jax.ShapeDtypeStruct((b_pad, c_pad), dtype),
            grid=(n_btiles, n_ctiles),
            in_specs=in_specs,
            out_specs=pl.BlockSpec((tb, tc), lambda i, j: (i, j)),
            scratch_shapes=[pltpu.VMEM((tb, d_pad), dtype)],
            compiler_params=pltpu.CompilerParams(
                dimension_semantics=("parallel", "arbitrary"),
                vmem_limit_bytes=int(vmem_limit)),
            cost_estimate=cost,
        )

    call_args = xs + [packed["w_cat"], packed["b_cat"]]
    if n_ctiles == 1:
        try:
            out_padded = _build(True)(*call_args)
        except Exception:
            # Fallback if this JAX version rejects single-buffered pipeline_mode.
            out_padded = _build(False)(*call_args)
    else:
        out_padded = _build(False)(*call_args)

    # Strip batch / channel padding (cheap XLA slice).
    return out_padded[:batch, :total_c]


def _reference(inputs, params):
    keys = sorted(params.keys())
    feats = []
    for k in keys:
        x = inputs[k]
        w = params[k]["w"]
        b = params[k]["b"].astype(jnp.float32)
        y = x.astype(jnp.float32) @ w.astype(jnp.float32) + b
        feats.append(y.astype(x.dtype))
    return jnp.concatenate(feats, axis=-1)


if __name__ == "__main__":
    key = jax.random.PRNGKey(0)

    # Feature spec: name -> (input_dim, out_channels).  Sorted key order
    # defines the channel layout of the concatenated output.
    feature_spec = {
        "alpha": (16, 32),
        "beta": (8, 16),
        "gamma": (32, 64),
    }
    batch = 8
    dtype = jnp.float32

    inputs = {}
    params = {}
    for name in sorted(feature_spec.keys()):
        d_in, c_out = feature_spec[name]
        key, kx, kw, kb = jax.random.split(key, 4)
        inputs[name] = jax.random.normal(kx, (batch, d_in), dtype=dtype)
        params[name] = {
            "w": jax.random.normal(kw, (d_in, c_out), dtype=jnp.float32) * 0.05,
            "b": jax.random.normal(kb, (c_out,), dtype=jnp.float32) * 0.01,
        }

    # Pack the block-diagonal weights once (outside the per-call path).
    packed = pack_multi_feature_params(params, dtype)

    out = multi_feature_embedding(inputs, packed)
    out = jax.block_until_ready(out)

    ref = _reference(inputs, params)
    total_c = sum(c for _, c in feature_spec.values())
    assert out.shape == (batch, total_c), out.shape
    assert jnp.allclose(out, ref, atol=1e-5, rtol=1e-5), "mismatch vs reference"

    print("KERNEL_OK")
</pallas_src>

<mosaic_0001>
module attributes {stable_mosaic.version = 11 : i64} {
  func.func @kernel(%arg0: i32, %arg1: i32, %arg2: memref<8x16xf32, #tpu.memory_space<vmem>>, %arg3: memref<8x8xf32, #tpu.memory_space<vmem>>, %arg4: memref<8x32xf32, #tpu.memory_space<vmem>>, %arg5: memref<128x128xf32, #tpu.memory_space<vmem>>, %arg6: memref<1x128xf32, #tpu.memory_space<vmem>>, %arg7: memref<8x128xf32, #tpu.memory_space<vmem>>, %arg8: memref<8x128xf32, #tpu.memory_space<vmem>>) attributes {dimension_semantics = [#tpu.dimension_semantics<parallel>, #tpu.dimension_semantics<arbitrary>], iteration_bounds = array<i64: 1, 1>, scalar_prefetch = 0 : i64, scratch_operands = 1 : i64, tpu.core_type = #tpu.core_type<tc>, window_params = [{transform_indices = @transform_0, window_bounds = array<i64: 8, 16>}, {transform_indices = @transform_1, window_bounds = array<i64: 8, 8>}, {transform_indices = @transform_2, window_bounds = array<i64: 8, 32>}, {pipeline_mode = #tpu.pipeline_mode<synchronous>, transform_indices = @transform_3, window_bounds = array<i64: 128, 128>}, {pipeline_mode = #tpu.pipeline_mode<synchronous>, transform_indices = @transform_4, window_bounds = array<i64: 1, 128>}, {transform_indices = @transform_5, window_bounds = array<i64: 8, 128>}]} {
    %c0_i32 = arith.constant 0 : i32
    %0 = arith.cmpi eq, %arg1, %c0_i32 : i32
    %1 = arith.extui %0 : i1 to i32
    %c0_i32_0 = arith.constant 0 : i32
    %2 = arith.cmpi ne, %1, %c0_i32_0 : i32
    scf.if %2 {
      %cst_8 = arith.constant 0.000000e+00 : f32
      %10 = vector.broadcast %cst_8 : f32 to vector<8x72xf32>
      %c0_9 = arith.constant 0 : index
      %c56 = arith.constant 56 : index
      %11 = vector.load %arg8[%c0_9, %c56] : memref<8x128xf32, #tpu.memory_space<vmem>>, vector<8x72xf32>
      tpu.vector_store %arg8[%c0_9, %c56], %10 {strides = array<i32>} : memref<8x128xf32, #tpu.memory_space<vmem>>, vector<8x72xf32>,
      %c0_10 = arith.constant 0 : index
      %c0_11 = arith.constant 0 : index
      %12 = vector.load %arg2[%c0_10, %c0_11] : memref<8x16xf32, #tpu.memory_space<vmem>>, vector<8x16xf32>
      %c0_12 = arith.constant 0 : index
      %c0_13 = arith.constant 0 : index
      %13 = vector.load %arg8[%c0_12, %c0_13] : memref<8x128xf32, #tpu.memory_space<vmem>>, vector<8x16xf32>
      tpu.vector_store %arg8[%c0_12, %c0_13], %12 {strides = array<i32>} : memref<8x128xf32, #tpu.memory_space<vmem>>, vector<8x16xf32>,
      %c0_14 = arith.constant 0 : index
      %c0_15 = arith.constant 0 : index
      %14 = vector.load %arg3[%c0_14, %c0_15] : memref<8x8xf32, #tpu.memory_space<vmem>>, vector<8x8xf32>
      %c0_16 = arith.constant 0 : index
      %c16 = arith.constant 16 : index
      %15 = vector.load %arg8[%c0_16, %c16] : memref<8x128xf32, #tpu.memory_space<vmem>>, vector<8x8xf32>
      tpu.vector_store %arg8[%c0_16, %c16], %14 {strides = array<i32>} : memref<8x128xf32, #tpu.memory_space<vmem>>, vector<8x8xf32>,
      %c0_17 = arith.constant 0 : index
      %c0_18 = arith.constant 0 : index
      %16 = vector.load %arg4[%c0_17, %c0_18] : memref<8x32xf32, #tpu.memory_space<vmem>>, vector<8x32xf32>
      %c0_19 = arith.constant 0 : index
      %c24 = arith.constant 24 : index
      %17 = vector.load %arg8[%c0_19, %c24] : memref<8x128xf32, #tpu.memory_space<vmem>>, vector<8x32xf32>
      tpu.vector_store %arg8[%c0_19, %c24], %16 {strides = array<i32>} : memref<8x128xf32, #tpu.memory_space<vmem>>, vector<8x32xf32>,
    } else {
    }
    %c0 = arith.constant 0 : index
    %c0_1 = arith.constant 0 : index
    %3 = vector.load %arg8[%c0, %c0_1] : memref<8x128xf32, #tpu.memory_space<vmem>>, vector<8x128xf32>
    %c0_2 = arith.constant 0 : index
    %c0_3 = arith.constant 0 : index
    %4 = vector.load %arg5[%c0_2, %c0_3] : memref<128x128xf32, #tpu.memory_space<vmem>>, vector<128x128xf32>
    %cst = arith.constant dense<0.000000e+00> : vector<8x128xf32>
    %5 = tpu.matmul %3, %4, %cst {dimension_numbers = #tpu.dot_dimension_numbers<[1], [0], [0], [1], [0, 0, 1, 1], [], []>} : vector<8x128xf32>, vector<128x128xf32>, vector<8x128xf32> -> vector<8x128xf32>
    %c0_4 = arith.constant 0 : index
    %c0_5 = arith.constant 0 : index
    %6 = vector.load %arg6[%c0_4, %c0_5] : memref<1x128xf32, #tpu.memory_space<vmem>>, vector<1x128xf32>
    %7 = vector.broadcast %6 : vector<1x128xf32> to vector<8x128xf32>
    %8 = arith.addf %5, %7 : vector<8x128xf32>
    %c0_6 = arith.constant 0 : index
    %c0_7 = arith.constant 0 : index
    %9 = vector.load %arg7[%c0_6, %c0_7] : memref<8x128xf32, #tpu.memory_space<vmem>>, vector<8x128xf32>
    tpu.vector_store %arg7[%c0_6, %c0_7], %8 {strides = array<i32>} : memref<8x128xf32, #tpu.memory_space<vmem>>, vector<8x128xf32>,
    return
  }
  func.func @transform_0(%arg0: i32, %arg1: i32) -> (i32, i32) {
    %c0_i32 = arith.constant 0 : i32
    %c0_i32_0 = arith.constant 0 : i32
    return %arg0, %c0_i32 : i32, i32
  }
  func.func @transform_1(%arg0: i32, %arg1: i32) -> (i32, i32) {
    %c0_i32 = arith.constant 0 : i32
    %c0_i32_0 = arith.constant 0 : i32
    return %arg0, %c0_i32 : i32, i32
  }
  func.func @transform_2(%arg0: i32, %arg1: i32) -> (i32, i32) {
    %c0_i32 = arith.constant 0 : i32
    %c0_i32_0 = arith.constant 0 : i32
    return %arg0, %c0_i32 : i32, i32
  }
  func.func @transform_3(%arg0: i32, %arg1: i32) -> (i32, i32) {
    %c0_i32 = arith.constant 0 : i32
    %c0_i32_0 = arith.constant 0 : i32
    return %c0_i32, %arg1 : i32, i32
  }
  func.func @transform_4(%arg0: i32, %arg1: i32) -> (i32, i32) {
    %c0_i32 = arith.constant 0 : i32
    %c0_i32_0 = arith.constant 0 : i32
    return %c0_i32, %arg1 : i32, i32
  }
  func.func @transform_5(%arg0: i32, %arg1: i32) -> (i32, i32) {
    %c0_i32 = arith.constant 0 : i32
    return %arg0, %arg1 : i32, i32
  }
}

module attributes {stable_mosaic.version = 11 : i64} {
  func.func @kernel(%arg0: i32, %arg1: i32, %arg2: memref<8x16xf32, #tpu.memory_space<vmem>>, %arg3: memref<8x8xf32, #tpu.memory_space<vmem>>, %arg4: memref<8x32xf32, #tpu.memory_space<vmem>>, %arg5: memref<128x128xf32, #tpu.memory_space<vmem>>, %arg6: memref<1x128xf32, #tpu.memory_space<vmem>>, %arg7: memref<8x128xf32, #tpu.memory_space<vmem>>, %arg8: memref<8x128xf32, #tpu.memory_space<vmem>>) attributes {dimension_semantics = [#tpu.dimension_semantics<parallel>, #tpu.dimension_semantics<arbitrary>], iteration_bounds = array<i64: 1, 1>, scalar_prefetch = 0 : i64, scratch_operands = 1 : i64, tpu.core_type = #tpu.core_type<tc>, window_params = [{transform_indices = @transform_0, window_bounds = array<i64: 8, 16>}, {transform_indices = @transform_1, window_bounds = array<i64: 8, 8>}, {transform_indices = @transform_2, window_bounds = array<i64: 8, 32>}, {transform_indices = @transform_3, window_bounds = array<i64: 128, 128>}, {transform_indices = @transform_4, window_bounds = array<i64: 1, 128>}, {transform_indices = @transform_5, window_bounds = array<i64: 8, 128>}]} {
    %c0_i32 = arith.constant 0 : i32
    %0 = arith.cmpi eq, %arg1, %c0_i32 : i32
    %1 = arith.extui %0 : i1 to i32
    %c0_i32_0 = arith.constant 0 : i32
    %2 = arith.cmpi ne, %1, %c0_i32_0 : i32
    scf.if %2 {
      %cst_8 = arith.constant 0.000000e+00 : f32
      %10 = vector.broadcast %cst_8 : f32 to vector<8x72xf32>
      %c0_9 = arith.constant 0 : index
      %c56 = arith.constant 56 : index
      %11 = vector.load %arg8[%c0_9, %c56] : memref<8x128xf32, #tpu.memory_space<vmem>>, vector<8x72xf32>
      tpu.vector_store %arg8[%c0_9, %c56], %10 {strides = array<i32>} : memref<8x128xf32, #tpu.memory_space<vmem>>, vector<8x72xf32>,
      %c0_10 = arith.constant 0 : index
      %c0_11 = arith.constant 0 : index
      %12 = vector.load %arg2[%c0_10, %c0_11] : memref<8x16xf32, #tpu.memory_space<vmem>>, vector<8x16xf32>
      %c0_12 = arith.constant 0 : index
      %c0_13 = arith.constant 0 : index
      %13 = vector.load %arg8[%c0_12, %c0_13] : memref<8x128xf32, #tpu.memory_space<vmem>>, vector<8x16xf32>
      tpu.vector_store %arg8[%c0_12, %c0_13], %12 {strides = array<i32>} : memref<8x128xf32, #tpu.memory_space<vmem>>, vector<8x16xf32>,
      %c0_14 = arith.constant 0 : index
      %c0_15 = arith.constant 0 : index
      %14 = vector.load %arg3[%c0_14, %c0_15] : memref<8x8xf32, #tpu.memory_space<vmem>>, vector<8x8xf32>
      %c0_16 = arith.constant 0 : index
      %c16 = arith.constant 16 : index
      %15 = vector.load %arg8[%c0_16, %c16] : memref<8x128xf32, #tpu.memory_space<vmem>>, vector<8x8xf32>
      tpu.vector_store %arg8[%c0_16, %c16], %14 {strides = array<i32>} : memref<8x128xf32, #tpu.memory_space<vmem>>, vector<8x8xf32>,
      %c0_17 = arith.constant 0 : index
      %c0_18 = arith.constant 0 : index
      %16 = vector.load %arg4[%c0_17, %c0_18] : memref<8x32xf32, #tpu.memory_space<vmem>>, vector<8x32xf32>
      %c0_19 = arith.constant 0 : index
      %c24 = arith.constant 24 : index
      %17 = vector.load %arg8[%c0_19, %c24] : memref<8x128xf32, #tpu.memory_space<vmem>>, vector<8x32xf32>
      tpu.vector_store %arg8[%c0_19, %c24], %16 {strides = array<i32>} : memref<8x128xf32, #tpu.memory_space<vmem>>, vector<8x32xf32>,
    } else {
    }
    %c0 = arith.constant 0 : index
    %c0_1 = arith.constant 0 : index
    %3 = vector.load %arg8[%c0, %c0_1] : memref<8x128xf32, #tpu.memory_space<vmem>>, vector<8x128xf32>
    %c0_2 = arith.constant 0 : index
    %c0_3 = arith.constant 0 : index
    %4 = vector.load %arg5[%c0_2, %c0_3] : memref<128x128xf32, #tpu.memory_space<vmem>>, vector<128x128xf32>
    %cst = arith.constant dense<0.000000e+00> : vector<8x128xf32>
    %5 = tpu.matmul %3, %4, %cst {dimension_numbers = #tpu.dot_dimension_numbers<[1], [0], [0], [1], [0, 0, 1, 1], [], []>} : vector<8x128xf32>, vector<128x128xf32>, vector<8x128xf32> -> vector<8x128xf32>
    %c0_4 = arith.constant 0 : index
    %c0_5 = arith.constant 0 : index
    %6 = vector.load %arg6[%c0_4, %c0_5] : memref<1x128xf32, #tpu.memory_space<vmem>>, vector<1x128xf32>
    %7 = vector.broadcast %6 : vector<1x128xf32> to vector<8x128xf32>
    %8 = arith.addf %5, %7 : vector<8x128xf32>
    %c0_6 = arith.constant 0 : index
    %c0_7 = arith.constant 0 : index
    %9 = vector.load %arg7[%c0_6, %c0_7] : memref<8x128xf32, #tpu.memory_space<vmem>>, vector<8x128xf32>
    tpu.vector_store %arg7[%c0_6, %c0_7], %8 {strides = array<i32>} : memref<8x128xf32, #tpu.memory_space<vmem>>, vector<8x128xf32>,
    return
  }
  func.func @transform_0(%arg0: i32, %arg1: i32) -> (i32, i32) {
    %c0_i32 = arith.constant 0 : i32
    %c0_i32_0 = arith.constant 0 : i32
    return %arg0, %c0_i32 : i32, i32
  }
  func.func @transform_1(%arg0: i32, %arg1: i32) -> (i32, i32) {
    %c0_i32 = arith.constant 0 : i32
    %c0_i32_0 = arith.constant 0 : i32
    return %arg0, %c0_i32 : i32, i32
  }
  func.func @transform_2(%arg0: i32, %arg1: i32) -> (i32, i32) {
    %c0_i32 = arith.constant 0 : i32
    %c0_i32_0 = arith.constant 0 : i32
    return %arg0, %c0_i32 : i32, i32
  }
  func.func @transform_3(%arg0: i32, %arg1: i32) -> (i32, i32) {
    %c0_i32 = arith.constant 0 : i32
    %c0_i32_0 = arith.constant 0 : i32
    return %c0_i32, %arg1 : i32, i32
  }
  func.func @transform_4(%arg0: i32, %arg1: i32) -> (i32, i32) {
    %c0_i32 = arith.constant 0 : i32
    %c0_i32_0 = arith.constant 0 : i32
    return %c0_i32, %arg1 : i32, i32
  }
  func.func @transform_5(%arg0: i32, %arg1: i32) -> (i32, i32) {
    %c0_i32 = arith.constant 0 : i32
    return %arg0, %arg1 : i32, i32
  }
}

</mosaic_0001>

<bundles_post_ra>
// kernel: tpu_custom_call.1
= control target key start
LH: loop header
LB: loop body
LE: loop exit
PB: predicated region body
PF: predicated region fallthrough
CT: control target
= control target key end

     0   :  { %10 = vsyncpa [#allocation4], 0  ;;  %s524_s0 = inlined_call_operand.hbm [shape: f32[8,16], index: 0, kind: input, shape index: {}]   ;;  %s525_s1 = inlined_call_operand.hbm [shape: f32[8,8], index: 1, kind: input, shape index: {}]   ;;  %s526_s2 = inlined_call_operand.hbm [shape: f32[8,32], index: 2, kind: input, shape index: {}]   ;;  %s527_s3 = inlined_call_operand.hbm [shape: f32[128,128], index: 3, kind: input, shape index: {}]   ;;  %s528_s4 = inlined_call_operand.vmem [shape: f32[1,128], index: 4, kind: input, shape index: {}]   ;;  %s529_s5 = inlined_call_operand.hbm [shape: f32[8,128], index: 5, kind: output, shape index: {}]  }
   0x1   :  { %11 = vsyncpa [#allocation7], 0 }
   0x2   :  { %12 = vsyncpa [#allocation10], 0 }
   0x3   :  { %13 = vsyncpa [#allocation5], 0  ;;  %s412_s18 = smov [#allocation6]   ;;  %s413_s20 = smov [#allocation3]  }
   0x4   :  { %s30_s19 = sshll.u32 %s412_s18, 4  ;;  %s20_s21 = sshll.u32 %s413_s20, 4  ;;  %s31_s19 = int_to_ptr.vmem [resolvable:$true] %s30_s19  ;;  %s21_s21 = int_to_ptr.vmem [resolvable:$true] %s20_s21 }
   0x5   :  { %s294_s24 = scalar_lea.hbm %s525_s1, 128 }
   0x6   :  { %p295_p0 = scmp.ne.s32.totalorder %s525_s1, %s294_s24  ;;  %p298_p1 = scmp.lt.u32.totalorder %s294_s24, %s525_s1 }
   0x8   :  { %p300_p2 = pnand %p298_p1, %p295_p0 }
   0xa   :  { %303 = shalt.err (!%p300_p2)
}
   0xb   :  { %s304_s29 = scalar_lea.vmem %s31_s19, 128  ;;  %p309_p4 = scmp.lt.s32.totalorder %s31_s19, %s31_s19 }
   0xc   :  { %p305_p3 = scmp.ne.s32.totalorder %s31_s19, %s304_s29  ;;  %p310_p5 = scmp.lt.s32.totalorder %s304_s29, %s304_s29 }
   0xe   :  { %p311_p6 = por %p310_p5, %p309_p4 }
  0x10   :  { %p312_p7 = pnand %p311_p6, %p305_p3 }
  0x12   :  { %315 = shalt.err (!%p312_p7)
}
  0x13   :  { %33 = dma.hbm_to_vmem [thread:$0]  %s525_s1, 128, %s31_s19, [#allocation7]  }
  0x14   :  { %s316_s9 = scalar_lea.hbm %s524_s0, 128 }
  0x15   :  { %p317_p8 = scmp.ne.s32.totalorder %s524_s0, %s316_s9  ;;  %p320_p9 = scmp.lt.u32.totalorder %s316_s9, %s524_s0 }
  0x17   :  { %p322_p10 = pnand %p320_p9, %p317_p8 }
  0x19   :  { %325 = shalt.err (!%p322_p10)
}
  0x1a   :  { %s326_s14 = scalar_lea.vmem %s21_s21, 128  ;;  %p331_p12 = scmp.lt.s32.totalorder %s21_s21, %s21_s21 }
  0x1b   :  { %p327_p11 = scmp.ne.s32.totalorder %s21_s21, %s326_s14  ;;  %p332_p13 = scmp.lt.s32.totalorder %s326_s14, %s326_s14 }
  0x1d   :  { %p333_p0 = por %p332_p13, %p331_p12 }
  0x1f   :  { %p334_p1 = pnand %p333_p0, %p327_p11 }
  0x21   :  { %337 = shalt.err (!%p334_p1)
}
  0x22   :  { %23 = dma.hbm_to_vmem [thread:$0]  %s524_s0, 128, %s21_s21, [#allocation4]  }
  0x23   :  { %s414_s16 = smov [#allocation8]   ;;  %s415_s18 = smov [#allocation9]  }
  0x24   :  { %s40_s17 = sshll.u32 %s414_s16, 4  ;;  %s49_s19 = sshll.u32 %s415_s18, 4  ;;  %s41_s17 = int_to_ptr.vmem [resolvable:$true] %s40_s17  ;;  %s478_s19 = int_to_ptr.vmem [resolvable:$true] %s49_s19 }
  0x25   :  { %s338_s23 = scalar_lea.hbm %s526_s2, 128 }
  0x26   :  { %p339_p2 = scmp.ne.s32.totalorder %s526_s2, %s338_s23  ;;  %p342_p3 = scmp.lt.u32.totalorder %s338_s23, %s526_s2 }
  0x28   :  { %p344_p4 = pnand %p342_p3, %p339_p2 }
  0x2a   :  { %347 = shalt.err (!%p344_p4)
}
  0x2b   :  { %s348_s0 = scalar_lea.vmem %s41_s17, 128  ;;  %p353_p6 = scmp.lt.s32.totalorder %s41_s17, %s41_s17 }
  0x2c   :  { %p349_p5 = scmp.ne.s32.totalorder %s41_s17, %s348_s0  ;;  %p354_p7 = scmp.lt.s32.totalorder %s348_s0, %s348_s0 }
  0x2e   :  { %p355_p8 = por %p354_p7, %p353_p6 }
  0x30   :  { %p356_p9 = pnand %p355_p8, %p349_p5 }
  0x32   :  { %359 = shalt.err (!%p356_p9)
}
  0x33   :  { %43 = dma.hbm_to_vmem [thread:$0]  %s526_s2, 128, %s41_s17, [#allocation7]  }
  0x34   :  { %s360_s6 = scalar_lea.hbm %s527_s3, 2048 }
  0x35   :  { %p361_p10 = scmp.ne.s32.totalorder %s527_s3, %s360_s6  ;;  %p364_p11 = scmp.lt.u32.totalorder %s360_s6, %s527_s3 }
  0x37   :  { %p366_p12 = pnand %p364_p11, %p361_p10 }
  0x39   :  { %369 = shalt.err (!%p366_p12)
}
  0x3a   :  { %s370_s11 = scalar_lea.vmem %s478_s19, 2048  ;;  %p375_p0 = scmp.lt.s32.totalorder %s478_s19, %s478_s19 }
  0x3b   :  { %p371_p13 = scmp.ne.s32.totalorder %s478_s19, %s370_s11  ;;  %p376_p1 = scmp.lt.s32.totalorder %s370_s11, %s370_s11 }
  0x3d   :  { %p377_p2 = por %p376_p1, %p375_p0 }
  0x3f   :  { %p378_p3 = pnand %p377_p2, %p371_p13 }
  0x41   :  { %381 = shalt.err (!%p378_p3)
}
  0x42   :  { %s416_s2 = smov 128   ;;  %s417_s12 = smov 8  }
  0x43   :  { %55 = dma.hbm_to_vmem [thread:$0]  %s527_s3, 2048, %s478_s19, [#allocation10], %s416_s2, %s416_s2, %s417_s12  }
  0x44   :  { %404 = dma.done.wait [#allocation4], 128  }
  0x45   :  { %405 = vsyncadd [#allocation4], 4294967168 }
  0x46   :  { %406 = dma.done.wait [#allocation7], 256  }
  0x47   :  { %407 = vsyncadd [#allocation7], 4294967040 }
  0x48   :  { %408 = dma.done.wait [#allocation10], 2048  }
  0x49   :  { %409 = vsyncadd [#allocation10], 4294965248  ;;  %vm74_vm0 = vcmask 1048000   ;;  %v418_v0 = vmov 0.0|0.0   ;;  %v419_v1 = vmov 0.0   ;;  %vm420_vm1 = vmmov 0  }
  0x4a   :  { %258 = vmatprep.subr.bf16.mxu0 %v418_v0  ;;  %75 = vst.msk [vmem:[#allocation2] sm:$0xff] %vm74_vm0, %v419_v1  ;;  %255 = vmatprep.mubr.msk.f32.mxu0 %vm420_vm1, %v419_v1  ;;  %v79_v2 = vld [vmem:[#allocation6] sm:$0xff]  ;;  %v94_v3 = vld [vmem:[#allocation9] sm:$0xff]  ;;  %s421_s1 = smov 16   ;;  %v95_v4 = vld [vmem:[#allocation9 + $0x8] sm:$0xff]  ;;  %vm77_vm2 = vcmask 130048  }
  0x4b   :  { %81 = vrot.lane.b32.xlu0 %v79_v2, %s421_s1  ;;  %v96_v5 = vld [vmem:[#allocation9 + $0x10] sm:$0xff]  ;;  %v97_v6 = vld [vmem:[#allocation9 + $0x18] sm:$0xff]  ;;  %v259_v8 = vpack.c.bf16 %v95_v4, %v94_v3  ;;  %s422_s3 = smov 24   ;;  %v98_v10 = vld [vmem:[#allocation9 + $0x20] sm:$0xff]  ;;  %vm84_vm3 = vcmask 195712   ;;  %vm91_vm4 = vcmask 457920  }
  0x4c   :  { %v86_v7 = vld [vmem:[#allocation8] sm:$0xff]  ;;  %v262_v9 = vpack.c.bf16 %v97_v6, %v96_v5  ;;  %v99_v11 = vld [vmem:[#allocation9 + $0x28] sm:$0xff]  ;;  %v100_v14 = vld [vmem:[#allocation9 + $0x30] sm:$0xff]  ;;  %s423_s17 = smov [#allocation11]  }
  0x4d   :  { %260 = vmatpush3.bf16.msra.mxu0 %v259_v8  ;;  %v76_v12 = vld [vmem:[#allocation3] sm:$0xff]  ;;  %v265_v13 = vpack.c.bf16 %v99_v11, %v98_v10  ;;  %v101_v15 = vld [vmem:[#allocation9 + $0x38] sm:$0xff]  ;;  %v102_v17 = vld [vmem:[#allocation9 + $0x40] sm:$0xff]  ;;  %s194_s18 = sshll.u32 %s423_s17, 4  ;;  %s195_s18 = int_to_ptr.vmem [resolvable:$true] %s194_s18 }
  0x4e   :  { %261 = vmatprep.subr.bf16.mxu0 %v418_v0  ;;  %78 = vst.msk [vmem:[#allocation2] sm:$0xff] %vm77_vm2, %v76_v12  ;;  %v268_v16 = vpack.c.bf16 %v101_v15, %v100_v14  ;;  %v103_v18 = vld [vmem:[#allocation9 + $0x48] sm:$0xff]  ;;  %v104_v20 = vld [vmem:[#allocation9 + $0x50] sm:$0xff]  ;;  %v105_v21 = vld [vmem:[#allocation9 + $0x58] sm:$0xff]  ;;  %s382_s19 = scalar_lea.vmem %s195_s18, 128  ;;  %p387_p5 = scmp.lt.s32.totalorder %s195_s18, %s195_s18 }
  0x4f   :  { %88 = vrot.lane.b32.xlu0 %v86_v7, %s422_s3  ;;  %v271_v19 = vpack.c.bf16 %v103_v18, %v102_v17  ;;  %v274_v22 = vpack.c.bf16 %v105_v21, %v104_v20  ;;  %v106_v23 = vld [vmem:[#allocation9 + $0x60] sm:$0xff]  ;;  %v107_v24 = vld [vmem:[#allocation9 + $0x68] sm:$0xff]  ;;  %v108_v26 = vld [vmem:[#allocation9 + $0x70] sm:$0xff]  ;;  %p383_p4 = scmp.ne.s32.totalorder %s195_s18, %s382_s19  ;;  %p388_p6 = scmp.lt.s32.totalorder %s382_s19, %s382_s19 }
  0x50   :  { %v277_v25 = vpack.c.bf16 %v107_v24, %v106_v23  ;;  %v109_v27 = vld [vmem:[#allocation9 + $0x78] sm:$0xff]  ;;  %v205_v32 = vld [vmem:[%s528_s4] ss:$0 sm:$0xff] }
  0x51   :  { %263 = vmatpush3.bf16.msra.mxu0 %v262_v9  ;;  %v280_v28 = vpack.c.bf16 %v109_v27, %v108_v26  ;;  %p389_p7 = por %p388_p6, %p387_p5 }
  0x52   :  { %264 = vmatprep.subr.bf16.mxu0 %v418_v0 }
  0x53   :  { %p390_p8 = pnand %p389_p7, %p383_p4 }
  0x55   :  { %266 = vmatpush3.bf16.msra.mxu0 %v265_v13 }
  0x56   :  { %267 = vmatprep.subr.bf16.mxu0 %v418_v0 }
  0x59   :  { %269 = vmatpush3.bf16.msra.mxu0 %v268_v16 }
  0x5a   :  { %270 = vmatprep.subr.bf16.mxu0 %v418_v0 }
  0x5d   :  { %272 = vmatpush3.bf16.msra.mxu0 %v271_v19 }
  0x5e   :  { %273 = vmatprep.subr.bf16.mxu0 %v418_v0 }
  0x61   :  { %275 = vmatpush3.bf16.msra.mxu0 %v274_v22 }
  0x62   :  { %276 = vmatprep.subr.bf16.mxu0 %v418_v0 }
  0x65   :  { %278 = vmatpush3.bf16.msra.mxu0 %v277_v25 }
  0x66   :  { %279 = vmatprep.subr.bf16.mxu0 %v418_v0 }
  0x69   :  { %281 = vmatpush3.bf16.msra.mxu0 %v280_v28 }
  0xbd   :  { %v82_v29 = vpop.permute.xlu0 %81 }
  0xbe   :  { %85 = vst.msk [vmem:[#allocation2] sm:$0xff] %vm84_vm3, %v82_v29 }
  0xc1   :  { %v89_v30 = vpop.permute.xlu0 %88 }
  0xc2   :  { %92 = vst.msk [vmem:[#allocation2] sm:$0xff] %vm91_vm4, %v89_v30 }
  0xc9   :  { %v93_v31 = vld [vmem:[#allocation2] sm:$0xff] }
  0xca   :  { %256 = vmatmul.mubr.f32.vlgmr.msra.gmra.mrb[0].mxu0 %v93_v31 }
 0x19d   :  { %v183_v33 = vpop.f32.mrb[0].mxu0 }
 0x19e   :  { %v184_v34 = vadd.f32 %v205_v32, %v183_v33  ;;  %v257_v35 = vpop.f32.mrb[1].mxu0 }
 0x1a0   :  { %187 = vst [vmem:[#allocation11] sm:$0xff] %v184_v34 }
 0x1a1   :  { %393 = shalt.err (!%p390_p8)
}
 0x1a2   :  { %s394_s23 = scalar_lea.hbm %s529_s5, 128 }
 0x1a3   :  { %p395_p9 = scmp.ne.s32.totalorder %s529_s5, %s394_s23  ;;  %p398_p10 = scmp.lt.u32.totalorder %s394_s23, %s529_s5 }
 0x1a5   :  { %p400_p11 = pnand %p398_p10, %p395_p9 }
 0x1a7   :  { %403 = shalt.err (!%p400_p11)
}
 0x1a8   :  { %197 = dma.vmem_to_hbm [thread:$0]  %s195_s18, 128, %s529_s5, [#allocation5]  }
 0x1a9   :  { %410 = dma.done.wait [#allocation5], 128  }
 0x1aa   :  { %411 = vsyncadd [#allocation5], 4294967168 }
 0x1ab   :  { %201 = vsyncpa [#allocation4], 1 }
 0x1ac   :  { %202 = vsyncpa [#allocation7], 1 }
 0x1ad   :  { %203 = vsyncpa [#allocation10], 1 }
 0x1ae   :  { %204 = vsyncpa [#allocation5], 1 }

// kernel: tpu_custom_call.1
= control target key start
LH: loop header
LB: loop body
LE: loop exit
PB: predicated region body
PF: predicated region fallthrough
CT: control target
= control target key end

     0   :  { %10 = vsyncpa [#allocation4], 0  ;;  %s524_s0 = inlined_call_operand.hbm [shape: f32[8,16], index: 0, kind: input, shape index: {}]   ;;  %s525_s1 = inlined_call_operand.hbm [shape: f32[8,8], index: 1, kind: input, shape index: {}]   ;;  %s526_s2 = inlined_call_operand.hbm [shape: f32[8,32], index: 2, kind: input, shape index: {}]   ;;  %s527_s3 = inlined_call_operand.hbm [shape: f32[128,128], index: 3, kind: input, shape index: {}]   ;;  %s528_s4 = inlined_call_operand.vmem [shape: f32[1,128], index: 4, kind: input, shape index: {}]   ;;  %s529_s5 = inlined_call_operand.hbm [shape: f32[8,128], index: 5, kind: output, shape index: {}]  }
   0x1   :  { %11 = vsyncpa [#allocation7], 0 }
   0x2   :  { %12 = vsyncpa [#allocation10], 0 }
   0x3   :  { %13 = vsyncpa [#allocation5], 0  ;;  %s412_s18 = smov [#allocation6]   ;;  %s413_s20 = smov [#allocation3]  }
   0x4   :  { %s30_s19 = sshll.u32 %s412_s18, 4  ;;  %s20_s21 = sshll.u32 %s413_s20, 4  ;;  %s31_s19 = int_to_ptr.vmem [resolvable:$true] %s30_s19  ;;  %s21_s21 = int_to_ptr.vmem [resolvable:$true] %s20_s21 }
   0x5   :  { %s294_s24 = scalar_lea.hbm %s525_s1, 128 }
   0x6   :  { %p295_p0 = scmp.ne.s32.totalorder %s525_s1, %s294_s24  ;;  %p298_p1 = scmp.lt.u32.totalorder %s294_s24, %s525_s1 }
   0x8   :  { %p300_p2 = pnand %p298_p1, %p295_p0 }
   0xa   :  { %303 = shalt.err (!%p300_p2)
}
   0xb   :  { %s304_s29 = scalar_lea.vmem %s31_s19, 128  ;;  %p309_p4 = scmp.lt.s32.totalorder %s31_s19, %s31_s19 }
   0xc   :  { %p305_p3 = scmp.ne.s32.totalorder %s31_s19, %s304_s29  ;;  %p310_p5 = scmp.lt.s32.totalorder %s304_s29, %s304_s29 }
   0xe   :  { %p311_p6 = por %p310_p5, %p309_p4 }
  0x10   :  { %p312_p7 = pnand %p311_p6, %p305_p3 }
  0x12   :  { %315 = shalt.err (!%p312_p7)
}
  0x13   :  { %33 = dma.hbm_to_vmem [thread:$0]  %s525_s1, 128, %s31_s19, [#allocation7]  }
  0x14   :  { %s316_s9 = scalar_lea.hbm %s524_s0, 128 }
  0x15   :  { %p317_p8 = scmp.ne.s32.totalorder %s524_s0, %s316_s9  ;;  %p320_p9 = scmp.lt.u32.totalorder %s316_s9, %s524_s0 }
  0x17   :  { %p322_p10 = pnand %p320_p9, %p317_p8 }
  0x19   :  { %325 = shalt.err (!%p322_p10)
}
  0x1a   :  { %s326_s14 = scalar_lea.vmem %s21_s21, 128  ;;  %p331_p12 = scmp.lt.s32.totalorder %s21_s21, %s21_s21 }
  0x1b   :  { %p327_p11 = scmp.ne.s32.totalorder %s21_s21, %s326_s14  ;;  %p332_p13 = scmp.lt.s32.totalorder %s326_s14, %s326_s14 }
  0x1d   :  { %p333_p0 = por %p332_p13, %p331_p12 }
  0x1f   :  { %p334_p1 = pnand %p333_p0, %p327_p11 }
  0x21   :  { %337 = shalt.err (!%p334_p1)
}
  0x22   :  { %23 = dma.hbm_to_vmem [thread:$0]  %s524_s0, 128, %s21_s21, [#allocation4]  }
  0x23   :  { %s414_s16 = smov [#allocation8]   ;;  %s415_s18 = smov [#allocation9]  }
  0x24   :  { %s40_s17 = sshll.u32 %s414_s16, 4  ;;  %s49_s19 = sshll.u32 %s415_s18, 4  ;;  %s41_s17 = int_to_ptr.vmem [resolvable:$true] %s40_s17  ;;  %s478_s19 = int_to_ptr.vmem [resolvable:$true] %s49_s19 }
  0x25   :  { %s338_s23 = scalar_lea.hbm %s526_s2, 128 }
  0x26   :  { %p339_p2 = scmp.ne.s32.totalorder %s526_s2, %s338_s23  ;;  %p342_p3 = scmp.lt.u32.totalorder %s338_s23, %s526_s2 }
  0x28   :  { %p344_p4 = pnand %p342_p3, %p339_p2 }
  0x2a   :  { %347 = shalt.err (!%p344_p4)
}
  0x2b   :  { %s348_s0 = scalar_lea.vmem %s41_s17, 128  ;;  %p353_p6 = scmp.lt.s32.totalorder %s41_s17, %s41_s17 }
  0x2c   :  { %p349_p5 = scmp.ne.s32.totalorder %s41_s17, %s348_s0  ;;  %p354_p7 = scmp.lt.s32.totalorder %s348_s0, %s348_s0 }
  0x2e   :  { %p355_p8 = por %p354_p7, %p353_p6 }
  0x30   :  { %p356_p9 = pnand %p355_p8, %p349_p5 }
  0x32   :  { %359 = shalt.err (!%p356_p9)
}
  0x33   :  { %43 = dma.hbm_to_vmem [thread:$0]  %s526_s2, 128, %s41_s17, [#allocation7]  }
  0x34   :  { %s360_s6 = scalar_lea.hbm %s527_s3, 2048 }
  0x35   :  { %p361_p10 = scmp.ne.s32.totalorder %s527_s3, %s360_s6  ;;  %p364_p11 = scmp.lt.u32.totalorder %s360_s6, %s527_s3 }
  0x37   :  { %p366_p12 = pnand %p364_p11, %p361_p10 }
  0x39   :  { %369 = shalt.err (!%p366_p12)
}
  0x3a   :  { %s370_s11 = scalar_lea.vmem %s478_s19, 2048  ;;  %p375_p0 = scmp.lt.s32.totalorder %s478_s19, %s478_s19 }
  0x3b   :  { %p371_p13 = scmp.ne.s32.totalorder %s478_s19, %s370_s11  ;;  %p376_p1 = scmp.lt.s32.totalorder %s370_s11, %s370_s11 }
  0x3d   :  { %p377_p2 = por %p376_p1, %p375_p0 }
  0x3f   :  { %p378_p3 = pnand %p377_p2, %p371_p13 }
  0x41   :  { %381 = shalt.err (!%p378_p3)
}
  0x42   :  { %s416_s2 = smov 128   ;;  %s417_s12 = smov 8  }
  0x43   :  { %55 = dma.hbm_to_vmem [thread:$0]  %s527_s3, 2048, %s478_s19, [#allocation10], %s416_s2, %s416_s2, %s417_s12  }
  0x44   :  { %404 = dma.done.wait [#allocation4], 128  }
  0x45   :  { %405 = vsyncadd [#allocation4], 4294967168 }
  0x46   :  { %406 = dma.done.wait [#allocation7], 256  }
  0x47   :  { %407 = vsyncadd [#allocation7], 4294967040 }
  0x48   :  { %408 = dma.done.wait [#allocation10], 2048  }
  0x49   :  { %409 = vsyncadd [#allocation10], 4294965248  ;;  %vm74_vm0 = vcmask 1048000   ;;  %v418_v0 = vmov 0.0|0.0   ;;  %v419_v1 = vmov 0.0   ;;  %vm420_vm1 = vmmov 0  }
  0x4a   :  { %258 = vmatprep.subr.bf16.mxu0 %v418_v0  ;;  %75 = vst.msk [vmem:[#allocation2] sm:$0xff] %vm74_vm0, %v419_v1  ;;  %255 = vmatprep.mubr.msk.f32.mxu0 %vm420_vm1, %v419_v1  ;;  %v79_v2 = vld [vmem:[#allocation6] sm:$0xff]  ;;  %v94_v3 = vld [vmem:[#allocation9] sm:$0xff]  ;;  %s421_s1 = smov 16   ;;  %v95_v4 = vld [vmem:[#allocation9 + $0x8] sm:$0xff]  ;;  %vm77_vm2 = vcmask 130048  }
  0x4b   :  { %81 = vrot.lane.b32.xlu0 %v79_v2, %s421_s1  ;;  %v96_v5 = vld [vmem:[#allocation9 + $0x10] sm:$0xff]  ;;  %v97_v6 = vld [vmem:[#allocation9 + $0x18] sm:$0xff]  ;;  %v259_v8 = vpack.c.bf16 %v95_v4, %v94_v3  ;;  %s422_s3 = smov 24   ;;  %v98_v10 = vld [vmem:[#allocation9 + $0x20] sm:$0xff]  ;;  %vm84_vm3 = vcmask 195712   ;;  %vm91_vm4 = vcmask 457920  }
  0x4c   :  { %v86_v7 = vld [vmem:[#allocation8] sm:$0xff]  ;;  %v262_v9 = vpack.c.bf16 %v97_v6, %v96_v5  ;;  %v99_v11 = vld [vmem:[#allocation9 + $0x28] sm:$0xff]  ;;  %v100_v14 = vld [vmem:[#allocation9 + $0x30] sm:$0xff]  ;;  %s423_s17 = smov [#allocation11]  }
  0x4d   :  { %260 = vmatpush3.bf16.msra.mxu0 %v259_v8  ;;  %v76_v12 = vld [vmem:[#allocation3] sm:$0xff]  ;;  %v265_v13 = vpack.c.bf16 %v99_v11, %v98_v10  ;;  %v101_v15 = vld [vmem:[#allocation9 + $0x38] sm:$0xff]  ;;  %v102_v17 = vld [vmem:[#allocation9 + $0x40] sm:$0xff]  ;;  %s194_s18 = sshll.u32 %s423_s17, 4  ;;  %s195_s18 = int_to_ptr.vmem [resolvable:$true] %s194_s18 }
  0x4e   :  { %261 = vmatprep.subr.bf16.mxu0 %v418_v0  ;;  %78 = vst.msk [vmem:[#allocation2] sm:$0xff] %vm77_vm2, %v76_v12  ;;  %v268_v16 = vpack.c.bf16 %v101_v15, %v100_v14  ;;  %v103_v18 = vld [vmem:[#allocation9 + $0x48] sm:$0xff]  ;;  %v104_v20 = vld [vmem:[#allocation9 + $0x50] sm:$0xff]  ;;  %v105_v21 = vld [vmem:[#allocation9 + $0x58] sm:$0xff]  ;;  %s382_s19 = scalar_lea.vmem %s195_s18, 128  ;;  %p387_p5 = scmp.lt.s32.totalorder %s195_s18, %s195_s18 }
  0x4f   :  { %88 = vrot.lane.b32.xlu0 %v86_v7, %s422_s3  ;;  %v271_v19 = vpack.c.bf16 %v103_v18, %v102_v17  ;;  %v274_v22 = vpack.c.bf16 %v105_v21, %v104_v20  ;;  %v106_v23 = vld [vmem:[#allocation9 + $0x60] sm:$0xff]  ;;  %v107_v24 = vld [vmem:[#allocation9 + $0x68] sm:$0xff]  ;;  %v108_v26 = vld [vmem:[#allocation9 + $0x70] sm:$0xff]  ;;  %p383_p4 = scmp.ne.s32.totalorder %s195_s18, %s382_s19  ;;  %p388_p6 = scmp.lt.s32.totalorder %s382_s19, %s382_s19 }
  0x50   :  { %v277_v25 = vpack.c.bf16 %v107_v24, %v106_v23  ;;  %v109_v27 = vld [vmem:[#allocation9 + $0x78] sm:$0xff]  ;;  %v205_v32 = vld [vmem:[%s528_s4] ss:$0 sm:$0xff] }
  0x51   :  { %263 = vmatpush3.bf16.msra.mxu0 %v262_v9  ;;  %v280_v28 = vpack.c.bf16 %v109_v27, %v108_v26  ;;  %p389_p7 = por %p388_p6, %p387_p5 }
  0x52   :  { %264 = vmatprep.subr.bf16.mxu0 %v418_v0 }
  0x53   :  { %p390_p8 = pnand %p389_p7, %p383_p4 }
  0x55   :  { %266 = vmatpush3.bf16.msra.mxu0 %v265_v13 }
  0x56   :  { %267 = vmatprep.subr.bf16.mxu0 %v418_v0 }
  0x59   :  { %269 = vmatpush3.bf16.msra.mxu0 %v268_v16 }
  0x5a   :  { %270 = vmatprep.subr.bf16.mxu0 %v418_v0 }
  0x5d   :  { %272 = vmatpush3.bf16.msra.mxu0 %v271_v19 }
  0x5e   :  { %273 = vmatprep.subr.bf16.mxu0 %v418_v0 }
  0x61   :  { %275 = vmatpush3.bf16.msra.mxu0 %v274_v22 }
  0x62   :  { %276 = vmatprep.subr.bf16.mxu0 %v418_v0 }
  0x65   :  { %278 = vmatpush3.bf16.msra.mxu0 %v277_v25 }
  0x66   :  { %279 = vmatprep.subr.bf16.mxu0 %v418_v0 }
  0x69   :  { %281 = vmatpush3.bf16.msra.mxu0 %v280_v28 }
  0xbd   :  { %v82_v29 = vpop.permute.xlu0 %81 }
  0xbe   :  { %85 = vst.msk [vmem:[#allocation2] sm:$0xff] %vm84_vm3, %v82_v29 }
  0xc1   :  { %v89_v30 = vpop.permute.xlu0 %88 }
  0xc2   :  { %92 = vst.msk [vmem:[#allocation2] sm:$0xff] %vm91_vm4, %v89_v30 }
  0xc9   :  { %v93_v31 = vld [vmem:[#allocation2] sm:$0xff] }
  0xca   :  { %256 = vmatmul.mubr.f32.vlgmr.msra.gmra.mrb[0].mxu0 %v93_v31 }
 0x19d   :  { %v183_v33 = vpop.f32.mrb[0].mxu0 }
 0x19e   :  { %v184_v34 = vadd.f32 %v205_v32, %v183_v33  ;;  %v257_v35 = vpop.f32.mrb[1].mxu0 }
 0x1a0   :  { %187 = vst [vmem:[#allocation11] sm:$0xff] %v184_v34 }
 0x1a1   :  { %393 = shalt.err (!%p390_p8)
}
 0x1a2   :  { %s394_s23 = scalar_lea.hbm %s529_s5, 128 }
 0x1a3   :  { %p395_p9 = scmp.ne.s32.totalorder %s529_s5, %s394_s23  ;;  %p398_p10 = scmp.lt.u32.totalorder %s394_s23, %s529_s5 }
 0x1a5   :  { %p400_p11 = pnand %p398_p10, %p395_p9 }
 0x1a7   :  { %403 = shalt.err (!%p400_p11)
}
 0x1a8   :  { %197 = dma.vmem_to_hbm [thread:$0]  %s195_s18, 128, %s529_s5, [#allocation5]  }
 0x1a9   :  { %410 = dma.done.wait [#allocation5], 128  }
 0x1aa   :  { %411 = vsyncadd [#allocation5], 4294967168 }
 0x1ab   :  { %201 = vsyncpa [#allocation4], 1 }
 0x1ac   :  { %202 = vsyncpa [#allocation7], 1 }
 0x1ad   :  { %203 = vsyncpa [#allocation10], 1 }
 0x1ae   :  { %204 = vsyncpa [#allocation5], 1 }

</bundles_post_ra>
